<compile_context>
chip_gen: v7x
topology: tpu7x:2x2x1
jax: 0.10.0
libtpu: 0.0.40
codegen_flags: <defaults>
</compile_context>

<pallas_src>
import functools

import jax
import jax.numpy as jnp
from jax.experimental import pallas as pl
from jax.experimental.pallas import tpu as pltpu

EPS = 1e-5  # PyTorch nn.LayerNorm default


def _round_up(a: int, b: int) -> int:
    return (a + b - 1) // b * b


def prenorm_linear_kernel(x_ref, w_ref, b_ref, o_ref, mean_ref, rstd_ref):
    """Fused PreNorm + Linear on one (TM, D) row tile / (D, TN) weight panel.

    x_ref:    (TM, D)   input tokens
    w_ref:    (D, TN)   folded weight  W' = diag(gamma) @ W   (in, out layout)
    b_ref:    (1, TN)   folded bias    b' = beta @ W + wb
    o_ref:    (TM, TN)  output panel
    mean_ref: (TM, 1)   f32 scratch (LN mean, computed once per row tile)
    rstd_ref: (TM, 1)   f32 scratch (LN 1/sqrt(var+eps))
    """
    x = x_ref[...].astype(jnp.float32)

    # LayerNorm statistics once per row tile (first weight panel); one-pass
    # var = E[x^2] - mean^2 (biased, matching PyTorch).
    @pl.when(pl.program_id(1) == 0)
    def _():
        inv_d = jnp.float32(1.0 / x.shape[-1])
        mean = jnp.sum(x, axis=-1, keepdims=True) * inv_d
        var = jnp.sum(x * x, axis=-1, keepdims=True) * inv_d - mean * mean
        mean_ref[...] = mean
        rstd_ref[...] = jax.lax.rsqrt(var + EPS)

    # Normalize (gamma/beta already folded into W'/b'), feed MXU in the
    # weight dtype, accumulate in f32.
    xn = (x - mean_ref[...]) * rstd_ref[...]
    out = jnp.dot(xn.astype(w_ref.dtype), w_ref[...],
                  preferred_element_type=jnp.float32)
    o_ref[...] = (out + b_ref[...].astype(jnp.float32)).astype(o_ref.dtype)


def prenorm(x, gamma, beta, w, wb, *, tm: int = 512, tn: int = 512):
    """x: (B, S, D) -> (B, S, D); PreNorm(dim, Linear(dim, dim)).

    gamma/beta: (1, D) LayerNorm params; w: (D, D) stored (in, out); wb: (1, D).
    """
    B, S, D = x.shape
    rows = B * S

    # Row tile: multiple of the dtype's sublane packing (8 f32 / 16 bf16 / 32 int8).
    x_itemsize = jnp.dtype(x.dtype).itemsize
    sub = 8 * max(1, 4 // x_itemsize)
    TM = min(tm, _round_up(rows, sub))
    TM = max(sub, TM - TM % sub)

    # Fold LayerNorm affine into the Linear (tiny one-off ops on the params).
    w_f32 = w.astype(jnp.float32)
    wp = (w_f32 * gamma.reshape(D, 1).astype(jnp.float32)).astype(w.dtype)
    bp = (beta.astype(jnp.float32) @ w_f32 + wb.astype(jnp.float32))  # (1, D) f32

    # Weight panel width: keep the whole weight VMEM-resident when it is small
    # enough, otherwise stream (D, TN) column panels (TN multiple of 128).
    w_itemsize = jnp.dtype(wp.dtype).itemsize
    weight_resident = D * D * w_itemsize <= 24 * 1024 * 1024
    if weight_resident or D % 128 != 0:
        TN = D
    else:
        TN = min(D, tn)
    n_tiles = pl.cdiv(D, TN)
    w_invariant = n_tiles == 1
    # TODO(synk): for D so large that the (TM, D) activation tile itself does
    # not fit VMEM, add a K-tiled path with an f32 accumulator scratch.

    # Explicit scoped-VMEM budget (defaults are 16/32/32 MiB on v5e/v6e/v7x).
    vmem_bytes = (
        (1 if w_invariant else 2) * D * TN * w_itemsize   # weight buffer(s)
        + 2 * TM * D * x_itemsize                         # x tile (double-buffered)
        + 2 * TM * TN * x_itemsize                        # out tile
        + (1 if w_invariant else 2) * TN * 4              # bias buffer(s)
        + 4 * TM * 4                                      # stat scratches
    )
    vmem_limit = int(min(128 * 1024 * 1024,
                         max(32 * 1024 * 1024, int(vmem_bytes * 1.5) + (2 << 20))))

    x_spec = pl.BlockSpec((TM, D), lambda i, n: (i, 0))
    if w_invariant:
        # Grid-invariant operands: single buffer (no pointless double-buffering).
        w_spec = pl.BlockSpec((D, TN), lambda i, n: (0, n),
                              pipeline_mode=pl.Buffered(1))
        b_spec = pl.BlockSpec((1, TN), lambda i, n: (0, n),
                              pipeline_mode=pl.Buffered(1))
    else:
        w_spec = pl.BlockSpec((D, TN), lambda i, n: (0, n))
        b_spec = pl.BlockSpec((1, TN), lambda i, n: (0, n))
    out_spec = pl.BlockSpec((TM, TN), lambda i, n: (i, n))

    x2 = x.reshape(rows, D)

    # TODO(synk): on v7x verify the row axis shards across both TensorCores;
    # if not, switch it to pltpu.CORE_PARALLEL.
    out = pl.pallas_call(
        prenorm_linear_kernel,
        out_shape=jax.ShapeDtypeStruct((rows, D), x.dtype),
        grid_spec=pltpu.PrefetchScalarGridSpec(
            num_scalar_prefetch=0,
            grid=(pl.cdiv(rows, TM), n_tiles),
            in_specs=[x_spec, w_spec, b_spec],
            out_specs=out_spec,
            scratch_shapes=[pltpu.VMEM((TM, 1), jnp.float32),
                            pltpu.VMEM((TM, 1), jnp.float32)],
        ),
        compiler_params=pltpu.CompilerParams(
            dimension_semantics=("parallel", "arbitrary"),
            vmem_limit_bytes=vmem_limit,
        ),
    )(x2, wp, bp)

    return out.reshape(B, S, D)


def prenorm_ref(x, gamma, beta, w, wb):
    """Pure-JAX reference (unfolded) for the correctness check."""
    xf = x.astype(jnp.float32)
    mean = jnp.mean(xf, axis=-1, keepdims=True)
    var = jnp.mean((xf - mean) ** 2, axis=-1, keepdims=True)
    xn = (xf - mean) * jax.lax.rsqrt(var + EPS)
    y = xn * gamma[0] + beta[0]
    out = jnp.dot(y, w, precision=jax.lax.Precision.HIGHEST) + wb[0]
    return out.astype(x.dtype)


if __name__ == "__main__":
    B, S, D = 2, 8, 32
    key = jax.random.PRNGKey(0)
    kx, kg, kb, kw, kwb = jax.random.split(key, 5)

    x = jax.random.normal(kx, (B, S, D), dtype=jnp.float32)

    # LayerNorm params (non-trivial so the affine fold is actually exercised).
    gamma = 1.0 + 0.1 * jax.random.normal(kg, (1, D), dtype=jnp.float32)
    beta = 0.1 * jax.random.normal(kb, (1, D), dtype=jnp.float32)

    # fn = Linear(D, D), deterministic synthetic weights (stored as (in, out)).
    w = jax.random.normal(kw, (D, D), dtype=jnp.float32) * 0.02
    wb = jax.random.normal(kwb, (1, D), dtype=jnp.float32) * 0.02

    out = jax.jit(prenorm)(x, gamma, beta, w, wb)
    out = jax.block_until_ready(out)

    ref = prenorm_ref(x, gamma, beta, w, wb)
    assert out.shape == (B, S, D)
    assert jnp.allclose(out, ref, atol=1e-3, rtol=1e-3), "mismatch vs reference"

    print("KERNEL_OK")
</pallas_src>

<mosaic_0001>
module attributes {stable_mosaic.version = 11 : i64} {
  func.func @prenorm_linear_kernel(%arg0: i32, %arg1: i32, %arg2: memref<16x32xf32, #tpu.memory_space<vmem>>, %arg3: memref<32x32xf32, #tpu.memory_space<vmem>>, %arg4: memref<1x32xf32, #tpu.memory_space<vmem>>, %arg5: memref<16x32xf32, #tpu.memory_space<vmem>>, %arg6: memref<16x1xf32, #tpu.memory_space<vmem>>, %arg7: memref<16x1xf32, #tpu.memory_space<vmem>>) attributes {dimension_semantics = [#tpu.dimension_semantics<parallel>, #tpu.dimension_semantics<arbitrary>], iteration_bounds = array<i64: 1, 1>, scalar_prefetch = 0 : i64, scratch_operands = 2 : i64, tpu.core_type = #tpu.core_type<tc>, window_params = [{transform_indices = @transform_0, window_bounds = array<i64: 16, 32>}, {pipeline_mode = #tpu.pipeline_mode<synchronous>, transform_indices = @transform_1, window_bounds = array<i64: 32, 32>}, {pipeline_mode = #tpu.pipeline_mode<synchronous>, transform_indices = @transform_2, window_bounds = array<i64: 1, 32>}, {transform_indices = @transform_3, window_bounds = array<i64: 16, 32>}]} {
    %c0 = arith.constant 0 : index
    %c0_0 = arith.constant 0 : index
    %0 = vector.load %arg2[%c0, %c0_0] : memref<16x32xf32, #tpu.memory_space<vmem>>, vector<16x32xf32>
    %c0_i32 = arith.constant 0 : i32
    %1 = arith.cmpi eq, %arg1, %c0_i32 : i32
    %2 = arith.extui %1 : i1 to i32
    %c0_i32_1 = arith.constant 0 : i32
    %3 = arith.cmpi ne, %2, %c0_i32_1 : i32
    scf.if %3 {
      %cst_12 = arith.constant dense<0.000000e+00> : vector<16xf32>
      %16 = vector.multi_reduction <add>, %0, %cst_12 [1] : vector<16x32xf32> to vector<16xf32>
      %17 = vector.shape_cast %16 : vector<16xf32> to vector<16x1xf32>
      %cst_13 = arith.constant 3.125000e-02 : f32
      %18 = vector.broadcast %cst_13 : f32 to vector<16x1xf32>
      %19 = arith.mulf %17, %18 : vector<16x1xf32>
      %20 = arith.mulf %0, %0 : vector<16x32xf32>
      %cst_14 = arith.constant dense<0.000000e+00> : vector<16xf32>
      %21 = vector.multi_reduction <add>, %20, %cst_14 [1] : vector<16x32xf32> to vector<16xf32>
      %22 = vector.shape_cast %21 : vector<16xf32> to vector<16x1xf32>
      %cst_15 = arith.constant 3.125000e-02 : f32
      %23 = vector.broadcast %cst_15 : f32 to vector<16x1xf32>
      %24 = arith.mulf %22, %23 : vector<16x1xf32>
      %25 = arith.mulf %19, %19 : vector<16x1xf32>
      %26 = arith.subf %24, %25 : vector<16x1xf32>
      %c0_16 = arith.constant 0 : index
      %c0_17 = arith.constant 0 : index
      %27 = vector.load %arg6[%c0_16, %c0_17] : memref<16x1xf32, #tpu.memory_space<vmem>>, vector<16x1xf32>
      tpu.vector_store %arg6[%c0_16, %c0_17], %19 {strides = array<i32>} : memref<16x1xf32, #tpu.memory_space<vmem>>, vector<16x1xf32>,
      %cst_18 = arith.constant 9.99999974E-6 : f32
      %28 = vector.broadcast %cst_18 : f32 to vector<16x1xf32>
      %29 = arith.addf %26, %28 : vector<16x1xf32>
      %30 = math.rsqrt %29 : vector<16x1xf32>
      %c0_19 = arith.constant 0 : index
      %c0_20 = arith.constant 0 : index
      %31 = vector.load %arg7[%c0_19, %c0_20] : memref<16x1xf32, #tpu.memory_space<vmem>>, vector<16x1xf32>
      tpu.vector_store %arg7[%c0_19, %c0_20], %30 {strides = array<i32>} : memref<16x1xf32, #tpu.memory_space<vmem>>, vector<16x1xf32>,
    } else {
    }
    %c0_2 = arith.constant 0 : index
    %c0_3 = arith.constant 0 : index
    %4 = vector.load %arg6[%c0_2, %c0_3] : memref<16x1xf32, #tpu.memory_space<vmem>>, vector<16x1xf32>
    %5 = vector.broadcast %4 : vector<16x1xf32> to vector<16x32xf32>
    %6 = arith.subf %0, %5 : vector<16x32xf32>
    %c0_4 = arith.constant 0 : index
    %c0_5 = arith.constant 0 : index
    %7 = vector.load %arg7[%c0_4, %c0_5] : memref<16x1xf32, #tpu.memory_space<vmem>>, vector<16x1xf32>
    %8 = vector.broadcast %7 : vector<16x1xf32> to vector<16x32xf32>
    %9 = arith.mulf %6, %8 : vector<16x32xf32>
    %c0_6 = arith.constant 0 : index
    %c0_7 = arith.constant 0 : index
    %10 = vector.load %arg3[%c0_6, %c0_7] : memref<32x32xf32, #tpu.memory_space<vmem>>, vector<32x32xf32>
    %cst = arith.constant dense<0.000000e+00> : vector<16x32xf32>
    %11 = tpu.matmul %9, %10, %cst {dimension_numbers = #tpu.dot_dimension_numbers<[1], [0], [0], [1], [0, 0, 1, 1], [], []>} : vector<16x32xf32>, vector<32x32xf32>, vector<16x32xf32> -> vector<16x32xf32>
    %c0_8 = arith.constant 0 : index
    %c0_9 = arith.constant 0 : index
    %12 = vector.load %arg4[%c0_8, %c0_9] : memref<1x32xf32, #tpu.memory_space<vmem>>, vector<1x32xf32>
    %13 = vector.broadcast %12 : vector<1x32xf32> to vector<16x32xf32>
    %14 = arith.addf %11, %13 : vector<16x32xf32>
    %c0_10 = arith.constant 0 : index
    %c0_11 = arith.constant 0 : index
    %15 = vector.load %arg5[%c0_10, %c0_11] : memref<16x32xf32, #tpu.memory_space<vmem>>, vector<16x32xf32>
    tpu.vector_store %arg5[%c0_10, %c0_11], %14 {strides = array<i32>} : memref<16x32xf32, #tpu.memory_space<vmem>>, vector<16x32xf32>,
    return
  }
  func.func @transform_0(%arg0: i32, %arg1: i32) -> (i32, i32) {
    %c0_i32 = arith.constant 0 : i32
    %c0_i32_0 = arith.constant 0 : i32
    return %arg0, %c0_i32 : i32, i32
  }
  func.func @transform_1(%arg0: i32, %arg1: i32) -> (i32, i32) {
    %c0_i32 = arith.constant 0 : i32
    %c0_i32_0 = arith.constant 0 : i32
    return %c0_i32, %arg1 : i32, i32
  }
  func.func @transform_2(%arg0: i32, %arg1: i32) -> (i32, i32) {
    %c0_i32 = arith.constant 0 : i32
    %c0_i32_0 = arith.constant 0 : i32
    return %c0_i32, %arg1 : i32, i32
  }
  func.func @transform_3(%arg0: i32, %arg1: i32) -> (i32, i32) {
    %c0_i32 = arith.constant 0 : i32
    return %arg0, %arg1 : i32, i32
  }
}

</mosaic_0001>

<bundles_post_ra>
// kernel: prenorm.1
= control target key start
LH: loop header
LB: loop body
LE: loop exit
PB: predicated region body
PF: predicated region fallthrough
CT: control target
= control target key end

     0   :  { %vm21_vm0 = vcmask 261120   ;;  %s335_s0 = inlined_call_operand.vmem [shape: f32[16,32], index: 0, kind: input, shape index: {}]   ;;  %s336_s1 = inlined_call_operand.vmem [shape: f32[32,32], index: 1, kind: input, shape index: {}]   ;;  %s337_s2 = inlined_call_operand.vmem [shape: f32[1,32], index: 2, kind: input, shape index: {}]   ;;  %s338_s3 = inlined_call_operand.hbm [shape: f32[16,32], index: 3, kind: output, shape index: {}]  }
   0x1   :  { %v281_v0 = vld [vmem:[%s335_s0] sm:$0xff]  ;;  %v286_v1 = vld [vmem:[%s335_s0 + $0x8] sm:$0xff] }
   0x2   :  { %8 = vsyncpa [#allocation5], 0  ;;  %v22_v2 = vsel %vm21_vm0, %v281_v0, 0.0  ;;  %v30_v3 = vmul.f32 %v281_v0, %v281_v0  ;;  %v31_v4 = vmul.f32 %v286_v1, %v286_v1  ;;  %v25_v6 = vsel %vm21_vm0, %v286_v1, 0.0  ;;  %v81_v25 = vld [vmem:[%s336_s1] sm:$0xff]  ;;  %v82_v26 = vld [vmem:[%s336_s1 + $0x8] sm:$0xff] }
   0x3   :  { %23 = vadd.xlane.f32.xlu0 %v22_v2  ;;  %v254_v8 = vmov 0   ;;  %vm44_vm1 = vcmask 7168   ;;  %v212_v27 = vpack.c.bf16 %v82_v26, %v81_v25  ;;  %v83_v31 = vld [vmem:[%s336_s1 + $0x10] sm:$0xff]  ;;  %v84_v32 = vld [vmem:[%s336_s1 + $0x18] sm:$0xff]  ;;  %v192_v43 = vld [vmem:[%s337_s2] ss:$0 sm:$0xff] }
   0x4   :  { %v32_v5 = vsel %vm21_vm0, %v30_v3, 0.0  ;;  %v35_v7 = vsel %vm21_vm0, %v31_v4, 0.0  ;;  %224 = vset.pattern.permute.xlu0 %v254_v8  ;;  %225 = vset.pattern.permute.xlu1 %v254_v8  ;;  %v216_v33 = vpack.c.bf16 %v84_v32, %v83_v31  ;;  %s255_s24 = smov [#allocation4]  }
   0x5   :  { %33 = vadd.xlane.f32.xlu1 %v32_v5  ;;  %213 = vmatprep.subr.bf16.mxu0 %v212_v27  ;;  %s181_s25 = sshll.u32 %s255_s24, 4  ;;  %s182_s25 = int_to_ptr.vmem [resolvable:$true] %s181_s25 }
   0x6   :  { %215 = vmatpush3.bf16.msra.mxu0 %v212_v27  ;;  %s230_s26 = scalar_lea.vmem %s182_s25, 256  ;;  %p235_p1 = scmp.lt.s32.totalorder %s182_s25, %s182_s25 }
   0x7   :  { %26 = vadd.xlane.f32.xlu0 %v25_v6  ;;  %217 = vmatprep.subr.bf16.mxu0 %v216_v33  ;;  %p231_p0 = scmp.ne.s32.totalorder %s182_s25, %s230_s26  ;;  %p236_p2 = scmp.lt.s32.totalorder %s230_s26, %s230_s26 }
   0x9   :  { %36 = vadd.xlane.f32.xlu1 %v35_v7  ;;  %p237_p3 = por %p236_p2, %p235_p1 }
   0xa   :  { %219 = vmatpush3.bf16.msra.mxu0 %v216_v33 }
   0xb   :  { %p238_p4 = pnand %p237_p3, %p231_p0 }
  0x90   :  { %v24_v9 = vpop.xlane.xlu0 %23 }
  0x91   :  { %v28_v10 = vmul.f32 0.03125, %v24_v9 }
  0x92   :  { %v34_v11 = vpop.xlane.xlu1 %33 }
  0x93   :  { %v40_v12 = vmul.f32 %v28_v10, %v28_v10  ;;  %45 = vst.msk [vmem:[#allocation2] sm:$0xff] %vm44_vm1, %v28_v10  ;;  %v38_v13 = vmul.f32 0.03125, %v34_v11 }
  0x94   :  { %v27_v14 = vpop.xlane.xlu0 %26 }
  0x95   :  { %v42_v15 = vsub.f32 %v38_v13, %v40_v12  ;;  %v29_v16 = vmul.f32 0.03125, %v27_v14 }
  0x96   :  { %v37_v17 = vpop.xlane.xlu1 %36 }
  0x97   :  { %v47_v18 = vadd.f32 1e-05, %v42_v15  ;;  %v41_v19 = vmul.f32 %v29_v16, %v29_v16  ;;  %46 = vst.msk [vmem:[#allocation2 + $0x8] sm:$0xff] %vm44_vm1, %v29_v16  ;;  %v39_v20 = vmul.f32 0.03125, %v37_v17 }
  0x99   :  { %226 = vrsqrt.f32 %v47_v18  ;;  %v43_v21 = vsub.f32 %v39_v20, %v41_v19 }
  0x9a   :  { %v53_v22 = vld [vmem:[#allocation2] sm:$0xff] }
  0x9b   :  { %v48_v23 = vadd.f32 1e-05, %v43_v21  ;;  %57 = vperm.xlu0 %224, %v53_v22  }
  0x9d   :  { %228 = vrsqrt.f32 %v48_v23 }
  0x9e   :  { %v54_v24 = vld [vmem:[#allocation2 + $0x8] sm:$0xff] }
  0x9f   :  { %62 = vperm.xlu1 %225, %v54_v24  }
  0xa3   :  { %v227_v28 = vpop.eup %226 }
  0xa4   :  { %51 = vst.msk [vmem:[#allocation3] sm:$0xff] %vm44_vm1, %v227_v28 }
  0xa7   :  { %v229_v29 = vpop.eup %228 }
  0xa8   :  { %52 = vst.msk [vmem:[#allocation3 + $0x8] sm:$0xff] %vm44_vm1, %v229_v29 }
  0xab   :  { %v67_v30 = vld [vmem:[#allocation3] sm:$0xff] }
  0xac   :  { %71 = vperm.xlu1 %225, %v67_v30  }
  0xaf   :  { %v68_v34 = vld [vmem:[#allocation3 + $0x8] sm:$0xff] }
  0xb0   :  { %76 = vperm.xlu1 %225, %v68_v34  }
 0x11a   :  { %v58_v35 = vpop.permute.xlu0 %57 }
 0x11b   :  { %v65_v37 = vsub.f32 %v281_v0, %v58_v35 }
 0x11e   :  { %v63_v36 = vpop.permute.xlu1 %62 }
 0x11f   :  { %v66_v40 = vsub.f32 %v286_v1, %v63_v36 }
 0x12b   :  { %v72_v38 = vpop.permute.xlu1 %71 }
 0x12c   :  { %v79_v39 = vmul.f32 %v72_v38, %v65_v37 }
 0x12e   :  { %209 = vmatprep.mubr.msk.f32.mxu0 %vm21_vm0, %v79_v39 }
 0x12f   :  { %v77_v41 = vpop.permute.xlu1 %76 }
 0x130   :  { %v80_v42 = vmul.f32 %v77_v41, %v66_v40 }
 0x132   :  { %210 = vmatmul.mubr.msk.f32.vlgmr.msra.gmra.mrb[0].mxu0 %vm21_vm0, %v80_v42 }
 0x205   :  { %v211_v44 = vpop.f32.mrb[0].mxu0 }
 0x206   :  { %v171_v45 = vadd.f32 %v211_v44, %v192_v43  ;;  %v165_v46 = vpop.f32.mrb[1].mxu0 }
 0x207   :  { %v166_v47 = vadd.f32 %v192_v43, %v165_v46 }
 0x208   :  { %175 = vst.msk [vmem:[#allocation4 + $0x8] sm:$0xff] %vm21_vm0, %v171_v45 }
 0x209   :  { %174 = vst.msk [vmem:[#allocation4] sm:$0xff] %vm21_vm0, %v166_v47 }
 0x20a   :  { %241 = shalt.err (!%p238_p4)
}
 0x20b   :  { %s242_s28 = scalar_lea.hbm %s338_s3, 256 }
 0x20c   :  { %p243_p5 = scmp.ne.s32.totalorder %s338_s3, %s242_s28  ;;  %p246_p6 = scmp.lt.u32.totalorder %s242_s28, %s338_s3 }
 0x20e   :  { %p248_p7 = pnand %p246_p6, %p243_p5 }
 0x210   :  { %251 = shalt.err (!%p248_p7)
}
 0x211   :  { %s256_s6 = smov 128   ;;  %s257_s7 = smov 8  }
 0x212   :  { %187 = dma.vmem_to_hbm [thread:$0]  %s182_s25, 256, %s338_s3, [#allocation5], %s256_s6, %s256_s6, %s257_s7  }
 0x213   :  { %252 = dma.done.wait [#allocation5], 256  }
 0x214   :  { %253 = vsyncadd [#allocation5], 4294967040 }
 0x215   :  { %191 = vsyncpa [#allocation5], 1 }

</bundles_post_ra>
